<compile_context>
chip_gen: v5e
topology: v5e:2x2
jax: 0.10.0
libtpu: 0.0.40
codegen_flags: <defaults>
</compile_context>

<pallas_src>
import math

import jax
import jax.numpy as jnp
from jax.experimental import pallas as pl
from jax.experimental.pallas import tpu as pltpu


def _round_up(x, m):
    return ((x + m - 1) // m) * m


# ------------------------------ Pallas kernel ------------------------------

def _soda_fused_kernel(xc_ref, p_ref,                 # activations (VMEM)
                       wc_ref, bc_ref,                # conv center-tap scalars (SMEM)
                       we_ref, be_ref,                # encoder fc (proprio rows folded in)
                       w1_ref, b1_ref, g_ref, bt_ref,  # MLP linear1 + BatchNorm
                       w2_ref, b2_ref,                # MLP linear2
                       o_ref,                         # (B, L_pad) f32 output
                       enc_in):                       # (B, CW_pad) f32 scratch
    n_f, n_c = wc_ref.shape
    B = xc_ref.shape[0]
    pix = xc_ref.shape[1] // n_c          # OH*OW center pixels per channel
    conv_w = n_f * pix
    n_prop = p_ref.shape[1]

    # Zero the scratch once: pad columns must be exactly 0 (uninitialized VMEM
    # could hold NaN bit patterns that would survive a 0-weight multiply).
    enc_in[...] = jnp.zeros_like(enc_in)

    # --- conv: 3x3 / stride-2 with center-tap-only weights == per-pixel channel
    # mix of the strided center pixels.  n_f*n_c scalar FMAs on (B, pix) tiles;
    # the ReLU'd result is written straight into the encoder-input scratch in the
    # native PyTorch (f, oh, ow) flatten order -> no reshape/transpose needed.
    for f in range(n_f):
        acc = wc_ref[f, 0] * xc_ref[:, 0:pix]
        for c in range(1, n_c):
            acc = acc + wc_ref[f, c] * xc_ref[:, c * pix:(c + 1) * pix]
        enc_in[:, f * pix:(f + 1) * pix] = jnp.maximum(acc + bc_ref[f], 0.0)

    # --- proprio branch folded into the (otherwise zero) pad columns -----------
    # (raw proprio, written AFTER the conv ReLU -> identical to torch.cat).
    enc_in[:, conv_w:conv_w + n_prop] = p_ref[...]

    # --- encoder fc (bf16 weights, f32 accumulation) + ReLU ---------------------
    lat = jnp.dot(enc_in[...].astype(we_ref.dtype), we_ref[...],
                  preferred_element_type=jnp.float32)
    lat = jnp.maximum(lat + be_ref[...], 0.0)                 # (B, L_pad)

    # --- SODAMLP: Linear -> BatchNorm1d (train-mode batch stats) -> ReLU --------
    h = jnp.dot(lat.astype(w1_ref.dtype), w1_ref[...],
                preferred_element_type=jnp.float32) + b1_ref[...]
    mean = jnp.mean(h, axis=0, keepdims=True)
    var = jnp.mean(jnp.square(h - mean), axis=0, keepdims=True)   # biased var
    inv = jax.lax.rsqrt(var + 1e-5)
    scale = g_ref[...] * inv                  # gamma pad entries are 0 -> pad cols stay 0
    shift = bt_ref[...] - mean * scale
    h = jnp.maximum(h * scale + shift, 0.0)                   # (B, H_pad)

    # --- final Linear ------------------------------------------------------------
    o_ref[...] = jnp.dot(h.astype(w2_ref.dtype), w2_ref[...],
                         preferred_element_type=jnp.float32) + b2_ref[...]


# ------------------------------ init helpers -------------------------------

def _orthogonal(key, shape, gain=1.0):
    """Deterministic orthogonal init, mimicking nn.init.orthogonal_."""
    rows, cols = shape
    n, m = max(rows, cols), min(rows, cols)
    a = jax.random.normal(key, (n, m), dtype=jnp.float32)
    q, r = jnp.linalg.qr(a)
    d = jnp.diagonal(r)
    q = q * jnp.where(d >= 0.0, 1.0, -1.0)      # deterministic sign, never zero
    if rows < cols:
        q = q.T
    return (gain * q[:rows, :cols]).astype(jnp.float32)


def make_params(key, *, img_c, img_hw, propri_dim, conv_f, latent_dim, hidden_dim,
                kernel=3, stride=2, weight_dtype=jnp.bfloat16):
    oh = (img_hw - kernel) // stride + 1
    pix = oh * oh
    conv_w = conv_f * pix                        # flattened conv features, (f, oh, ow)
    d_in = conv_w + propri_dim
    cw_pad = _round_up(d_in, 128)                # encoder-input lane padding
    l_pad = _round_up(latent_dim, 128)
    h_pad = _round_up(hidden_dim, 128)
    ks = jax.random.split(key, 4)
    gain_relu = math.sqrt(2.0)

    # Conv2d per weight_init: all-zero weight except orthogonal center tap with
    # ReLU gain, zero bias -> only the (F, C) center-tap matrix is ever needed.
    wc = _orthogonal(ks[0], (conv_f, img_c), gain_relu)       # (F, C) f32, SMEM scalars
    bc = jnp.zeros((conv_f,), jnp.float32)

    # Encoder fc: orthogonal (out, in) weight, zero bias.  PyTorch flattens the
    # conv activation in (f, oh, ow) order -- exactly the order the kernel writes,
    # so the rows are used as-is.  Proprio rows are folded in right after the conv
    # rows; remaining pad rows / pad columns are zero.
    w_enc = _orthogonal(ks[1], (latent_dim, d_in))
    we = jnp.zeros((cw_pad, l_pad), jnp.float32).at[:d_in, :latent_dim].set(w_enc.T)
    be = jnp.zeros((1, l_pad), jnp.float32)

    # SODAMLP: Linear -> BN -> ReLU -> Linear, stored (in, out), zero-padded to 128.
    w1 = jnp.zeros((l_pad, h_pad), jnp.float32).at[:latent_dim, :hidden_dim].set(
        _orthogonal(ks[2], (hidden_dim, latent_dim)).T)
    b1 = jnp.zeros((1, h_pad), jnp.float32)
    gamma = jnp.zeros((1, h_pad), jnp.float32).at[:, :hidden_dim].set(1.0)  # pad gammas 0
    beta = jnp.zeros((1, h_pad), jnp.float32)
    w2 = jnp.zeros((h_pad, l_pad), jnp.float32).at[:hidden_dim, :latent_dim].set(
        _orthogonal(ks[3], (latent_dim, hidden_dim)).T)
    b2 = jnp.zeros((1, l_pad), jnp.float32)

    return dict(
        wc=wc, bc=bc,
        we=we.astype(weight_dtype), be=be,
        w1=w1.astype(weight_dtype), b1=b1, gamma=gamma, beta=beta,
        w2=w2.astype(weight_dtype), b2=b2,
        # static metadata for the wrapper
        kernel=kernel, stride=stride, oh=oh, conv_f=conv_f,
        latent_dim=latent_dim, hidden_dim=hidden_dim,
        cw_pad=cw_pad, l_pad=l_pad, h_pad=h_pad, propri_dim=propri_dim)


# ------------------------------ forward pass --------------------------------

def soda_predictor_forward(params, images, propris):
    """images: (B, C, H, W) NCHW float32;  propris: (B, P) float32."""
    B, C = images.shape[0], images.shape[1]
    k2, s, oh = params["kernel"] // 2, params["stride"], params["oh"]
    pix = oh * oh

    # Center-tap extraction: after weight_init the 3x3 conv reads exactly the
    # pixels (s*i + k2, s*j + k2).  Strided slice + metadata reshape in the
    # wrapper; natural NCHW flatten keeps (c, p) order, consumed directly by the
    # kernel.  4x less activation traffic and no im2col / dense conv matrix.
    xc = images[:, :, k2:k2 + s * oh:s, k2:k2 + s * oh:s]
    xc = xc.reshape(B, C * pix).astype(jnp.float32)
    propris = propris.astype(jnp.float32)

    F_ = params["conv_f"]
    cw_pad, l_pad, h_pad = params["cw_pad"], params["l_pad"], params["h_pad"]

    flops = 2 * B * (C * pix * F_ + cw_pad * l_pad + l_pad * h_pad + h_pad * l_pad)
    bytes_accessed = (
        4 * (B * C * pix + B * propris.shape[1] + B * l_pad)        # activations + output
        + 2 * (cw_pad * l_pad + l_pad * h_pad + h_pad * l_pad)      # bf16 weights
        + 4 * (F_ * C + F_ + 5 * h_pad + 3 * l_pad))                # small f32 params
    cost = pl.CostEstimate(flops=flops, transcendentals=h_pad,
                           bytes_accessed=bytes_accessed)

    vmem = pl.BlockSpec(memory_space=pltpu.MemorySpace.VMEM)
    smem = pl.BlockSpec(memory_space=pltpu.MemorySpace.SMEM)

    out = pl.pallas_call(
        _soda_fused_kernel,
        out_shape=jax.ShapeDtypeStruct((B, l_pad), jnp.float32),
        in_specs=[vmem, vmem,              # xc, propris
                  smem, smem,              # conv center-tap weight / bias scalars
                  vmem, vmem,              # encoder fc weight / bias
                  vmem, vmem, vmem, vmem,  # w1, b1, gamma, beta
                  vmem, vmem],             # w2, b2
        out_specs=vmem,
        scratch_shapes=[pltpu.VMEM((B, cw_pad), jnp.float32)],
        cost_estimate=cost,
    )(
        xc, propris,
        params["wc"], params["bc"],
        params["we"], params["be"],
        params["w1"], params["b1"], params["gamma"], params["beta"],
        params["w2"], params["b2"],
    )
    # Pad latent columns are exactly zero by construction; slice them off.
    return out[:, :params["latent_dim"]]


# ----------------------------------- main -----------------------------------

if __name__ == "__main__":
    key = jax.random.PRNGKey(0)
    k_img, k_prop, k_par = jax.random.split(key, 3)

    B, C, HW, P = 2, 3, 16, 4
    LATENT, HIDDEN, CONV_F = 32, 64, 8

    images = jax.random.normal(k_img, (B, C, HW, HW), dtype=jnp.float32)
    propris = jax.random.normal(k_prop, (B, P), dtype=jnp.float32)

    params = make_params(k_par, img_c=C, img_hw=HW, propri_dim=P,
                         conv_f=CONV_F, latent_dim=LATENT, hidden_dim=HIDDEN)

    out = soda_predictor_forward(params, images, propris)
    out = jax.block_until_ready(out)
    assert out.shape == (B, LATENT) and out.dtype == jnp.float32
    print("KERNEL_OK")
</pallas_src>

<mosaic_0001>
module attributes {stable_mosaic.version = 11 : i64} {
  func.func @_soda_fused_kernel(%arg0: memref<2x147xf32, #tpu.memory_space<vmem>>, %arg1: memref<2x4xf32, #tpu.memory_space<vmem>>, %arg2: memref<8x3xf32, #tpu.memory_space<smem>>, %arg3: memref<8xf32, #tpu.memory_space<smem>>, %arg4: memref<512x128xbf16, #tpu.memory_space<vmem>>, %arg5: memref<1x128xf32, #tpu.memory_space<vmem>>, %arg6: memref<128x128xbf16, #tpu.memory_space<vmem>>, %arg7: memref<1x128xf32, #tpu.memory_space<vmem>>, %arg8: memref<1x128xf32, #tpu.memory_space<vmem>>, %arg9: memref<1x128xf32, #tpu.memory_space<vmem>>, %arg10: memref<128x128xbf16, #tpu.memory_space<vmem>>, %arg11: memref<1x128xf32, #tpu.memory_space<vmem>>, %arg12: memref<2x128xf32, #tpu.memory_space<vmem>>, %arg13: memref<2x512xf32, #tpu.memory_space<vmem>>) attributes {dimension_semantics = [], scalar_prefetch = 0 : i64, scratch_operands = 1 : i64, tpu.core_type = #tpu.core_type<tc>} {
    %cst = arith.constant 0.000000e+00 : f32
    %0 = vector.broadcast %cst : f32 to vector<2x512xf32>
    %c0 = arith.constant 0 : index
    %c0_0 = arith.constant 0 : index
    %1 = vector.load %arg13[%c0, %c0_0] : memref<2x512xf32, #tpu.memory_space<vmem>>, vector<2x512xf32>
    tpu.vector_store %arg13[%c0, %c0_0], %0 {strides = array<i32>} : memref<2x512xf32, #tpu.memory_space<vmem>>, vector<2x512xf32>,
    %c0_1 = arith.constant 0 : index
    %c0_2 = arith.constant 0 : index
    %2 = memref.load %arg2[%c0_1, %c0_2] : memref<8x3xf32, #tpu.memory_space<smem>>
    %c0_3 = arith.constant 0 : index
    %c0_4 = arith.constant 0 : index
    %3 = vector.load %arg0[%c0_3, %c0_4] : memref<2x147xf32, #tpu.memory_space<vmem>>, vector<2x49xf32>
    %4 = vector.broadcast %2 : f32 to vector<2x49xf32>
    %5 = arith.mulf %4, %3 : vector<2x49xf32>
    %c0_5 = arith.constant 0 : index
    %c1 = arith.constant 1 : index
    %6 = memref.load %arg2[%c0_5, %c1] : memref<8x3xf32, #tpu.memory_space<smem>>
    %c0_6 = arith.constant 0 : index
    %c49 = arith.constant 49 : index
    %7 = vector.load %arg0[%c0_6, %c49] : memref<2x147xf32, #tpu.memory_space<vmem>>, vector<2x49xf32>
    %8 = vector.broadcast %6 : f32 to vector<2x49xf32>
    %9 = arith.mulf %8, %7 : vector<2x49xf32>
    %10 = arith.addf %5, %9 : vector<2x49xf32>
    %c0_7 = arith.constant 0 : index
    %c2 = arith.constant 2 : index
    %11 = memref.load %arg2[%c0_7, %c2] : memref<8x3xf32, #tpu.memory_space<smem>>
    %c0_8 = arith.constant 0 : index
    %c98 = arith.constant 98 : index
    %12 = vector.load %arg0[%c0_8, %c98] : memref<2x147xf32, #tpu.memory_space<vmem>>, vector<2x49xf32>
    %13 = vector.broadcast %11 : f32 to vector<2x49xf32>
    %14 = arith.mulf %13, %12 : vector<2x49xf32>
    %15 = arith.addf %10, %14 : vector<2x49xf32>
    %c0_9 = arith.constant 0 : index
    %16 = memref.load %arg3[%c0_9] : memref<8xf32, #tpu.memory_space<smem>>
    %17 = vector.broadcast %16 : f32 to vector<2x49xf32>
    %18 = arith.addf %15, %17 : vector<2x49xf32>
    %cst_10 = arith.constant 0.000000e+00 : f32
    %19 = vector.broadcast %cst_10 : f32 to vector<2x49xf32>
    %20 = arith.maximumf %18, %19 : vector<2x49xf32>
    %c0_11 = arith.constant 0 : index
    %c0_12 = arith.constant 0 : index
    %21 = vector.load %arg13[%c0_11, %c0_12] : memref<2x512xf32, #tpu.memory_space<vmem>>, vector<2x49xf32>
    tpu.vector_store %arg13[%c0_11, %c0_12], %20 {strides = array<i32>} : memref<2x512xf32, #tpu.memory_space<vmem>>, vector<2x49xf32>,
    %c1_13 = arith.constant 1 : index
    %c0_14 = arith.constant 0 : index
    %22 = memref.load %arg2[%c1_13, %c0_14] : memref<8x3xf32, #tpu.memory_space<smem>>
    %c0_15 = arith.constant 0 : index
    %c0_16 = arith.constant 0 : index
    %23 = vector.load %arg0[%c0_15, %c0_16] : memref<2x147xf32, #tpu.memory_space<vmem>>, vector<2x49xf32>
    %24 = vector.broadcast %22 : f32 to vector<2x49xf32>
    %25 = arith.mulf %24, %23 : vector<2x49xf32>
    %c1_17 = arith.constant 1 : index
    %c1_18 = arith.constant 1 : index
    %26 = memref.load %arg2[%c1_17, %c1_18] : memref<8x3xf32, #tpu.memory_space<smem>>
    %c0_19 = arith.constant 0 : index
    %c49_20 = arith.constant 49 : index
    %27 = vector.load %arg0[%c0_19, %c49_20] : memref<2x147xf32, #tpu.memory_space<vmem>>, vector<2x49xf32>
    %28 = vector.broadcast %26 : f32 to vector<2x49xf32>
    %29 = arith.mulf %28, %27 : vector<2x49xf32>
    %30 = arith.addf %25, %29 : vector<2x49xf32>
    %c1_21 = arith.constant 1 : index
    %c2_22 = arith.constant 2 : index
    %31 = memref.load %arg2[%c1_21, %c2_22] : memref<8x3xf32, #tpu.memory_space<smem>>
    %c0_23 = arith.constant 0 : index
    %c98_24 = arith.constant 98 : index
    %32 = vector.load %arg0[%c0_23, %c98_24] : memref<2x147xf32, #tpu.memory_space<vmem>>, vector<2x49xf32>
    %33 = vector.broadcast %31 : f32 to vector<2x49xf32>
    %34 = arith.mulf %33, %32 : vector<2x49xf32>
    %35 = arith.addf %30, %34 : vector<2x49xf32>
    %c1_25 = arith.constant 1 : index
    %36 = memref.load %arg3[%c1_25] : memref<8xf32, #tpu.memory_space<smem>>
    %37 = vector.broadcast %36 : f32 to vector<2x49xf32>
    %38 = arith.addf %35, %37 : vector<2x49xf32>
    %cst_26 = arith.constant 0.000000e+00 : f32
    %39 = vector.broadcast %cst_26 : f32 to vector<2x49xf32>
    %40 = arith.maximumf %38, %39 : vector<2x49xf32>
    %c0_27 = arith.constant 0 : index
    %c49_28 = arith.constant 49 : index
    %41 = vector.load %arg13[%c0_27, %c49_28] : memref<2x512xf32, #tpu.memory_space<vmem>>, vector<2x49xf32>
    tpu.vector_store %arg13[%c0_27, %c49_28], %40 {strides = array<i32>} : memref<2x512xf32, #tpu.memory_space<vmem>>, vector<2x49xf32>,
    %c2_29 = arith.constant 2 : index
    %c0_30 = arith.constant 0 : index
    %42 = memref.load %arg2[%c2_29, %c0_30] : memref<8x3xf32, #tpu.memory_space<smem>>
    %c0_31 = arith.constant 0 : index
    %c0_32 = arith.constant 0 : index
    %43 = vector.load %arg0[%c0_31, %c0_32] : memref<2x147xf32, #tpu.memory_space<vmem>>, vector<2x49xf32>
    %44 = vector.broadcast %42 : f32 to vector<2x49xf32>
    %45 = arith.mulf %44, %43 : vector<2x49xf32>
    %c2_33 = arith.constant 2 : index
    %c1_34 = arith.constant 1 : index
    %46 = memref.load %arg2[%c2_33, %c1_34] : memref<8x3xf32, #tpu.memory_space<smem>>
    %c0_35 = arith.constant 0 : index
    %c49_36 = arith.constant 49 : index
    %47 = vector.load %arg0[%c0_35, %c49_36] : memref<2x147xf32, #tpu.memory_space<vmem>>, vector<2x49xf32>
    %48 = vector.broadcast %46 : f32 to vector<2x49xf32>
    %49 = arith.mulf %48, %47 : vector<2x49xf32>
    %50 = arith.addf %45, %49 : vector<2x49xf32>
    %c2_37 = arith.constant 2 : index
    %c2_38 = arith.constant 2 : index
    %51 = memref.load %arg2[%c2_37, %c2_38] : memref<8x3xf32, #tpu.memory_space<smem>>
    %c0_39 = arith.constant 0 : index
    %c98_40 = arith.constant 98 : index
    %52 = vector.load %arg0[%c0_39, %c98_40] : memref<2x147xf32, #tpu.memory_space<vmem>>, vector<2x49xf32>
    %53 = vector.broadcast %51 : f32 to vector<2x49xf32>
    %54 = arith.mulf %53, %52 : vector<2x49xf32>
    %55 = arith.addf %50, %54 : vector<2x49xf32>
    %c2_41 = arith.constant 2 : index
    %56 = memref.load %arg3[%c2_41] : memref<8xf32, #tpu.memory_space<smem>>
    %57 = vector.broadcast %56 : f32 to vector<2x49xf32>
    %58 = arith.addf %55, %57 : vector<2x49xf32>
    %cst_42 = arith.constant 0.000000e+00 : f32
    %59 = vector.broadcast %cst_42 : f32 to vector<2x49xf32>
    %60 = arith.maximumf %58, %59 : vector<2x49xf32>
    %c0_43 = arith.constant 0 : index
    %c98_44 = arith.constant 98 : index
    %61 = vector.load %arg13[%c0_43, %c98_44] : memref<2x512xf32, #tpu.memory_space<vmem>>, vector<2x49xf32>
    tpu.vector_store %arg13[%c0_43, %c98_44], %60 {strides = array<i32>} : memref<2x512xf32, #tpu.memory_space<vmem>>, vector<2x49xf32>,
    %c3 = arith.constant 3 : index
    %c0_45 = arith.constant 0 : index
    %62 = memref.load %arg2[%c3, %c0_45] : memref<8x3xf32, #tpu.memory_space<smem>>
    %c0_46 = arith.constant 0 : index
    %c0_47 = arith.constant 0 : index
    %63 = vector.load %arg0[%c0_46, %c0_47] : memref<2x147xf32, #tpu.memory_space<vmem>>, vector<2x49xf32>
    %64 = vector.broadcast %62 : f32 to vector<2x49xf32>
    %65 = arith.mulf %64, %63 : vector<2x49xf32>
    %c3_48 = arith.constant 3 : index
    %c1_49 = arith.constant 1 : index
    %66 = memref.load %arg2[%c3_48, %c1_49] : memref<8x3xf32, #tpu.memory_space<smem>>
    %c0_50 = arith.constant 0 : index
    %c49_51 = arith.constant 49 : index
    %67 = vector.load %arg0[%c0_50, %c49_51] : memref<2x147xf32, #tpu.memory_space<vmem>>, vector<2x49xf32>
    %68 = vector.broadcast %66 : f32 to vector<2x49xf32>
    %69 = arith.mulf %68, %67 : vector<2x49xf32>
    %70 = arith.addf %65, %69 : vector<2x49xf32>
    %c3_52 = arith.constant 3 : index
    %c2_53 = arith.constant 2 : index
    %71 = memref.load %arg2[%c3_52, %c2_53] : memref<8x3xf32, #tpu.memory_space<smem>>
    %c0_54 = arith.constant 0 : index
    %c98_55 = arith.constant 98 : index
    %72 = vector.load %arg0[%c0_54, %c98_55] : memref<2x147xf32, #tpu.memory_space<vmem>>, vector<2x49xf32>
    %73 = vector.broadcast %71 : f32 to vector<2x49xf32>
    %74 = arith.mulf %73, %72 : vector<2x49xf32>
    %75 = arith.addf %70, %74 : vector<2x49xf32>
    %c3_56 = arith.constant 3 : index
    %76 = memref.load %arg3[%c3_56] : memref<8xf32, #tpu.memory_space<smem>>
    %77 = vector.broadcast %76 : f32 to vector<2x49xf32>
    %78 = arith.addf %75, %77 : vector<2x49xf32>
    %cst_57 = arith.constant 0.000000e+00 : f32
    %79 = vector.broadcast %cst_57 : f32 to vector<2x49xf32>
    %80 = arith.maximumf %78, %79 : vector<2x49xf32>
    %c0_58 = arith.constant 0 : index
    %c147 = arith.constant 147 : index
    %81 = vector.load %arg13[%c0_58, %c147] : memref<2x512xf32, #tpu.memory_space<vmem>>, vector<2x49xf32>
    tpu.vector_store %arg13[%c0_58, %c147], %80 {strides = array<i32>} : memref<2x512xf32, #tpu.memory_space<vmem>>, vector<2x49xf32>,
    %c4 = arith.constant 4 : index
    %c0_59 = arith.constant 0 : index
    %82 = memref.load %arg2[%c4, %c0_59] : memref<8x3xf32, #tpu.memory_space<smem>>
    %c0_60 = arith.constant 0 : index
    %c0_61 = arith.constant 0 : index
    %83 = vector.load %arg0[%c0_60, %c0_61] : memref<2x147xf32, #tpu.memory_space<vmem>>, vector<2x49xf32>
    %84 = vector.broadcast %82 : f32 to vector<2x49xf32>
    %85 = arith.mulf %84, %83 : vector<2x49xf32>
    %c4_62 = arith.constant 4 : index
    %c1_63 = arith.constant 1 : index
    %86 = memref.load %arg2[%c4_62, %c1_63] : memref<8x3xf32, #tpu.memory_space<smem>>
    %c0_64 = arith.constant 0 : index
    %c49_65 = arith.constant 49 : index
    %87 = vector.load %arg0[%c0_64, %c49_65] : memref<2x147xf32, #tpu.memory_space<vmem>>, vector<2x49xf32>
    %88 = vector.broadcast %86 : f32 to vector<2x49xf32>
    %89 = arith.mulf %88, %87 : vector<2x49xf32>
    %90 = arith.addf %85, %89 : vector<2x49xf32>
    %c4_66 = arith.constant 4 : index
    %c2_67 = arith.constant 2 : index
    %91 = memref.load %arg2[%c4_66, %c2_67] : memref<8x3xf32, #tpu.memory_space<smem>>
    %c0_68 = arith.constant 0 : index
    %c98_69 = arith.constant 98 : index
    %92 = vector.load %arg0[%c0_68, %c98_69] : memref<2x147xf32, #tpu.memory_space<vmem>>, vector<2x49xf32>
    %93 = vector.broadcast %91 : f32 to vector<2x49xf32>
    %94 = arith.mulf %93, %92 : vector<2x49xf32>
    %95 = arith.addf %90, %94 : vector<2x49xf32>
    %c4_70 = arith.constant 4 : index
    %96 = memref.load %arg3[%c4_70] : memref<8xf32, #tpu.memory_space<smem>>
    %97 = vector.broadcast %96 : f32 to vector<2x49xf32>
    %98 = arith.addf %95, %97 : vector<2x49xf32>
    %cst_71 = arith.constant 0.000000e+00 : f32
    %99 = vector.broadcast %cst_71 : f32 to vector<2x49xf32>
    %100 = arith.maximumf %98, %99 : vector<2x49xf32>
    %c0_72 = arith.constant 0 : index
    %c196 = arith.constant 196 : index
    %101 = vector.load %arg13[%c0_72, %c196] : memref<2x512xf32, #tpu.memory_space<vmem>>, vector<2x49xf32>
    tpu.vector_store %arg13[%c0_72, %c196], %100 {strides = array<i32>} : memref<2x512xf32, #tpu.memory_space<vmem>>, vector<2x49xf32>,
    %c5 = arith.constant 5 : index
    %c0_73 = arith.constant 0 : index
    %102 = memref.load %arg2[%c5, %c0_73] : memref<8x3xf32, #tpu.memory_space<smem>>
    %c0_74 = arith.constant 0 : index
    %c0_75 = arith.constant 0 : index
    %103 = vector.load %arg0[%c0_74, %c0_75] : memref<2x147xf32, #tpu.memory_space<vmem>>, vector<2x49xf32>
    %104 = vector.broadcast %102 : f32 to vector<2x49xf32>
    %105 = arith.mulf %104, %103 : vector<2x49xf32>
    %c5_76 = arith.constant 5 : index
    %c1_77 = arith.constant 1 : index
    %106 = memref.load %arg2[%c5_76, %c1_77] : memref<8x3xf32, #tpu.memory_space<smem>>
    %c0_78 = arith.constant 0 : index
    %c49_79 = arith.constant 49 : index
    %107 = vector.load %arg0[%c0_78, %c49_79] : memref<2x147xf32, #tpu.memory_space<vmem>>, vector<2x49xf32>
    %108 = vector.broadcast %106 : f32 to vector<2x49xf32>
    %109 = arith.mulf %108, %107 : vector<2x49xf32>
    %110 = arith.addf %105, %109 : vector<2x49xf32>
    %c5_80 = arith.constant 5 : index
    %c2_81 = arith.constant 2 : index
    %111 = memref.load %arg2[%c5_80, %c2_81] : memref<8x3xf32, #tpu.memory_space<smem>>
    %c0_82 = arith.constant 0 : index
    %c98_83 = arith.constant 98 : index
    %112 = vector.load %arg0[%c0_82, %c98_83] : memref<2x147xf32, #tpu.memory_space<vmem>>, vector<2x49xf32>
    %113 = vector.broadcast %111 : f32 to vector<2x49xf32>
    %114 = arith.mulf %113, %112 : vector<2x49xf32>
    %115 = arith.addf %110, %114 : vector<2x49xf32>
    %c5_84 = arith.constant 5 : index
    %116 = memref.load %arg3[%c5_84] : memref<8xf32, #tpu.memory_space<smem>>
    %117 = vector.broadcast %116 : f32 to vector<2x49xf32>
    %118 = arith.addf %115, %117 : vector<2x49xf32>
    %cst_85 = arith.constant 0.000000e+00 : f32
    %119 = vector.broadcast %cst_85 : f32 to vector<2x49xf32>
    %120 = arith.maximumf %118, %119 : vector<2x49xf32>
    %c0_86 = arith.constant 0 : index
    %c245 = arith.constant 245 : index
    %121 = vector.load %arg13[%c0_86, %c245] : memref<2x512xf32, #tpu.memory_space<vmem>>, vector<2x49xf32>
    tpu.vector_store %arg13[%c0_86, %c245], %120 {strides = array<i32>} : memref<2x512xf32, #tpu.memory_space<vmem>>, vector<2x49xf32>,
    %c6 = arith.constant 6 : index
    %c0_87 = arith.constant 0 : index
    %122 = memref.load %arg2[%c6, %c0_87] : memref<8x3xf32, #tpu.memory_space<smem>>
    %c0_88 = arith.constant 0 : index
    %c0_89 = arith.constant 0 : index
    %123 = vector.load %arg0[%c0_88, %c0_89] : memref<2x147xf32, #tpu.memory_space<vmem>>, vector<2x49xf32>
    %124 = vector.broadcast %122 : f32 to vector<2x49xf32>
    %125 = arith.mulf %124, %123 : vector<2x49xf32>
    %c6_90 = arith.constant 6 : index
    %c1_91 = arith.constant 1 : index
    %126 = memref.load %arg2[%c6_90, %c1_91] : memref<8x3xf32, #tpu.memory_space<smem>>
    %c0_92 = arith.constant 0 : index
    %c49_93 = arith.constant 49 : index
    %127 = vector.load %arg0[%c0_92, %c49_93] : memref<2x147xf32, #tpu.memory_space<vmem>>, vector<2x49xf32>
    %128 = vector.broadcast %126 : f32 to vector<2x49xf32>
    %129 = arith.mulf %128, %127 : vector<2x49xf32>
    %130 = arith.addf %125, %129 : vector<2x49xf32>
    %c6_94 = arith.constant 6 : index
    %c2_95 = arith.constant 2 : index
    %131 = memref.load %arg2[%c6_94, %c2_95] : memref<8x3xf32, #tpu.memory_space<smem>>
    %c0_96 = arith.constant 0 : index
    %c98_97 = arith.constant 98 : index
    %132 = vector.load %arg0[%c0_96, %c98_97] : memref<2x147xf32, #tpu.memory_space<vmem>>, vector<2x49xf32>
    %133 = vector.broadcast %131 : f32 to vector<2x49xf32>
    %134 = arith.mulf %133, %132 : vector<2x49xf32>
    %135 = arith.addf %130, %134 : vector<2x49xf32>
    %c6_98 = arith.constant 6 : index
    %136 = memref.load %arg3[%c6_98] : memref<8xf32, #tpu.memory_space<smem>>
    %137 = vector.broadcast %136 : f32 to vector<2x49xf32>
    %138 = arith.addf %135, %137 : vector<2x49xf32>
    %cst_99 = arith.constant 0.000000e+00 : f32
    %139 = vector.broadcast %cst_99 : f32 to vector<2x49xf32>
    %140 = arith.maximumf %138, %139 : vector<2x49xf32>
    %c0_100 = arith.constant 0 : index
    %c294 = arith.constant 294 : index
    %141 = vector.load %arg13[%c0_100, %c294] : memref<2x512xf32, #tpu.memory_space<vmem>>, vector<2x49xf32>
    tpu.vector_store %arg13[%c0_100, %c294], %140 {strides = array<i32>} : memref<2x512xf32, #tpu.memory_space<vmem>>, vector<2x49xf32>,
    %c7 = arith.constant 7 : index
    %c0_101 = arith.constant 0 : index
    %142 = memref.load %arg2[%c7, %c0_101] : memref<8x3xf32, #tpu.memory_space<smem>>
    %c0_102 = arith.constant 0 : index
    %c0_103 = arith.constant 0 : index
    %143 = vector.load %arg0[%c0_102, %c0_103] : memref<2x147xf32, #tpu.memory_space<vmem>>, vector<2x49xf32>
    %144 = vector.broadcast %142 : f32 to vector<2x49xf32>
    %145 = arith.mulf %144, %143 : vector<2x49xf32>
    %c7_104 = arith.constant 7 : index
    %c1_105 = arith.constant 1 : index
    %146 = memref.load %arg2[%c7_104, %c1_105] : memref<8x3xf32, #tpu.memory_space<smem>>
    %c0_106 = arith.constant 0 : index
    %c49_107 = arith.constant 49 : index
    %147 = vector.load %arg0[%c0_106, %c49_107] : memref<2x147xf32, #tpu.memory_space<vmem>>, vector<2x49xf32>
    %148 = vector.broadcast %146 : f32 to vector<2x49xf32>
    %149 = arith.mulf %148, %147 : vector<2x49xf32>
    %150 = arith.addf %145, %149 : vector<2x49xf32>
    %c7_108 = arith.constant 7 : index
    %c2_109 = arith.constant 2 : index
    %151 = memref.load %arg2[%c7_108, %c2_109] : memref<8x3xf32, #tpu.memory_space<smem>>
    %c0_110 = arith.constant 0 : index
    %c98_111 = arith.constant 98 : index
    %152 = vector.load %arg0[%c0_110, %c98_111] : memref<2x147xf32, #tpu.memory_space<vmem>>, vector<2x49xf32>
    %153 = vector.broadcast %151 : f32 to vector<2x49xf32>
    %154 = arith.mulf %153, %152 : vector<2x49xf32>
    %155 = arith.addf %150, %154 : vector<2x49xf32>
    %c7_112 = arith.constant 7 : index
    %156 = memref.load %arg3[%c7_112] : memref<8xf32, #tpu.memory_space<smem>>
    %157 = vector.broadcast %156 : f32 to vector<2x49xf32>
    %158 = arith.addf %155, %157 : vector<2x49xf32>
    %cst_113 = arith.constant 0.000000e+00 : f32
    %159 = vector.broadcast %cst_113 : f32 to vector<2x49xf32>
    %160 = arith.maximumf %158, %159 : vector<2x49xf32>
    %c0_114 = arith.constant 0 : index
    %c343 = arith.constant 343 : index
    %161 = vector.load %arg13[%c0_114, %c343] : memref<2x512xf32, #tpu.memory_space<vmem>>, vector<2x49xf32>
    tpu.vector_store %arg13[%c0_114, %c343], %160 {strides = array<i32>} : memref<2x512xf32, #tpu.memory_space<vmem>>, vector<2x49xf32>,
    %c0_115 = arith.constant 0 : index
    %c0_116 = arith.constant 0 : index
    %162 = vector.load %arg1[%c0_115, %c0_116] : memref<2x4xf32, #tpu.memory_space<vmem>>, vector<2x4xf32>
    %c0_117 = arith.constant 0 : index
    %c392 = arith.constant 392 : index
    %163 = vector.load %arg13[%c0_117, %c392] : memref<2x512xf32, #tpu.memory_space<vmem>>, vector<2x4xf32>
    tpu.vector_store %arg13[%c0_117, %c392], %162 {strides = array<i32>} : memref<2x512xf32, #tpu.memory_space<vmem>>, vector<2x4xf32>,
    %c0_118 = arith.constant 0 : index
    %c0_119 = arith.constant 0 : index
    %164 = vector.load %arg13[%c0_118, %c0_119] : memref<2x512xf32, #tpu.memory_space<vmem>>, vector<2x512xf32>
    %165 = arith.truncf %164 : vector<2x512xf32> to vector<2x512xbf16>
    %c0_120 = arith.constant 0 : index
    %c0_121 = arith.constant 0 : index
    %166 = vector.load %arg4[%c0_120, %c0_121] : memref<512x128xbf16, #tpu.memory_space<vmem>>, vector<512x128xbf16>
    %cst_122 = arith.constant dense<0.000000e+00> : vector<2x128xf32>
    %167 = tpu.matmul %165, %166, %cst_122 {dimension_numbers = #tpu.dot_dimension_numbers<[1], [0], [0], [1], [0, 0, 1, 1], [], []>} : vector<2x512xbf16>, vector<512x128xbf16>, vector<2x128xf32> -> vector<2x128xf32>
    %c0_123 = arith.constant 0 : index
    %c0_124 = arith.constant 0 : index
    %168 = vector.load %arg5[%c0_123, %c0_124] : memref<1x128xf32, #tpu.memory_space<vmem>>, vector<1x128xf32>
    %169 = vector.broadcast %168 : vector<1x128xf32> to vector<2x128xf32>
    %170 = arith.addf %167, %169 : vector<2x128xf32>
    %cst_125 = arith.constant 0.000000e+00 : f32
    %171 = vector.broadcast %cst_125 : f32 to vector<2x128xf32>
    %172 = arith.maximumf %170, %171 : vector<2x128xf32>
    %173 = arith.truncf %172 : vector<2x128xf32> to vector<2x128xbf16>
    %c0_126 = arith.constant 0 : index
    %c0_127 = arith.constant 0 : index
    %174 = vector.load %arg6[%c0_126, %c0_127] : memref<128x128xbf16, #tpu.memory_space<vmem>>, vector<128x128xbf16>
    %cst_128 = arith.constant dense<0.000000e+00> : vector<2x128xf32>
    %175 = tpu.matmul %173, %174, %cst_128 {dimension_numbers = #tpu.dot_dimension_numbers<[1], [0], [0], [1], [0, 0, 1, 1], [], []>} : vector<2x128xbf16>, vector<128x128xbf16>, vector<2x128xf32> -> vector<2x128xf32>
    %c0_129 = arith.constant 0 : index
    %c0_130 = arith.constant 0 : index
    %176 = vector.load %arg7[%c0_129, %c0_130] : memref<1x128xf32, #tpu.memory_space<vmem>>, vector<1x128xf32>
    %177 = vector.broadcast %176 : vector<1x128xf32> to vector<2x128xf32>
    %178 = arith.addf %175, %177 : vector<2x128xf32>
    %cst_131 = arith.constant dense<0.000000e+00> : vector<128xf32>
    %179 = vector.multi_reduction <add>, %178, %cst_131 [0] : vector<2x128xf32> to vector<128xf32>
    %180 = vector.shape_cast %179 : vector<128xf32> to vector<1x128xf32>
    %cst_132 = arith.constant 2.000000e+00 : f32
    %181 = vector.broadcast %cst_132 : f32 to vector<1x128xf32>
    %182 = arith.divf %180, %181 : vector<1x128xf32>
    %183 = vector.broadcast %182 : vector<1x128xf32> to vector<2x128xf32>
    %184 = arith.subf %178, %183 : vector<2x128xf32>
    %185 = arith.mulf %184, %184 : vector<2x128xf32>
    %cst_133 = arith.constant dense<0.000000e+00> : vector<128xf32>
    %186 = vector.multi_reduction <add>, %185, %cst_133 [0] : vector<2x128xf32> to vector<128xf32>
    %187 = vector.shape_cast %186 : vector<128xf32> to vector<1x128xf32>
    %cst_134 = arith.constant 2.000000e+00 : f32
    %188 = vector.broadcast %cst_134 : f32 to vector<1x128xf32>
    %189 = arith.divf %187, %188 : vector<1x128xf32>
    %cst_135 = arith.constant 9.99999974E-6 : f32
    %190 = vector.broadcast %cst_135 : f32 to vector<1x128xf32>
    %191 = arith.addf %189, %190 : vector<1x128xf32>
    %192 = math.rsqrt %191 : vector<1x128xf32>
    %c0_136 = arith.constant 0 : index
    %c0_137 = arith.constant 0 : index
    %193 = vector.load %arg8[%c0_136, %c0_137] : memref<1x128xf32, #tpu.memory_space<vmem>>, vector<1x128xf32>
    %194 = arith.mulf %193, %192 : vector<1x128xf32>
    %c0_138 = arith.constant 0 : index
    %c0_139 = arith.constant 0 : index
    %195 = vector.load %arg9[%c0_138, %c0_139] : memref<1x128xf32, #tpu.memory_space<vmem>>, vector<1x128xf32>
    %196 = arith.mulf %182, %194 : vector<1x128xf32>
    %197 = arith.subf %195, %196 : vector<1x128xf32>
    %198 = vector.broadcast %194 : vector<1x128xf32> to vector<2x128xf32>
    %199 = arith.mulf %178, %198 : vector<2x128xf32>
    %200 = vector.broadcast %197 : vector<1x128xf32> to vector<2x128xf32>
    %201 = arith.addf %199, %200 : vector<2x128xf32>
    %cst_140 = arith.constant 0.000000e+00 : f32
    %202 = vector.broadcast %cst_140 : f32 to vector<2x128xf32>
    %203 = arith.maximumf %201, %202 : vector<2x128xf32>
    %204 = arith.truncf %203 : vector<2x128xf32> to vector<2x128xbf16>
    %c0_141 = arith.constant 0 : index
    %c0_142 = arith.constant 0 : index
    %205 = vector.load %arg10[%c0_141, %c0_142] : memref<128x128xbf16, #tpu.memory_space<vmem>>, vector<128x128xbf16>
    %cst_143 = arith.constant dense<0.000000e+00> : vector<2x128xf32>
    %206 = tpu.matmul %204, %205, %cst_143 {dimension_numbers = #tpu.dot_dimension_numbers<[1], [0], [0], [1], [0, 0, 1, 1], [], []>} : vector<2x128xbf16>, vector<128x128xbf16>, vector<2x128xf32> -> vector<2x128xf32>
    %c0_144 = arith.constant 0 : index
    %c0_145 = arith.constant 0 : index
    %207 = vector.load %arg11[%c0_144, %c0_145] : memref<1x128xf32, #tpu.memory_space<vmem>>, vector<1x128xf32>
    %208 = vector.broadcast %207 : vector<1x128xf32> to vector<2x128xf32>
    %209 = arith.addf %206, %208 : vector<2x128xf32>
    %c0_146 = arith.constant 0 : index
    %c0_147 = arith.constant 0 : index
    %210 = vector.load %arg12[%c0_146, %c0_147] : memref<2x128xf32, #tpu.memory_space<vmem>>, vector<2x128xf32>
    tpu.vector_store %arg12[%c0_146, %c0_147], %209 {strides = array<i32>} : memref<2x128xf32, #tpu.memory_space<vmem>>, vector<2x128xf32>,
    return
  }
}

</mosaic_0001>

<bundles_post_ra>
// kernel: tpu_custom_call.1
= control target key start
LH: loop header
LB: loop body
LE: loop exit
PB: predicated region body
PF: predicated region fallthrough
CT: control target
= control target key end

     0   :  { %17 = vsyncpa [#allocation6], 0  ;;  %s1641_s0 = inlined_call_operand.vmem [shape: f32[2,147], index: 0, kind: input, shape index: {}]   ;;  %s1642_s1 = inlined_call_operand.vmem [shape: f32[2,4], index: 1, kind: input, shape index: {}]   ;;  %s1643_s2 = inlined_call_operand.vmem [shape: f32[8,3], index: 2, kind: input, shape index: {}]   ;;  %s1644_s3 = inlined_call_operand.vmem [shape: f32[8], index: 3, kind: input, shape index: {}]   ;;  %s1645_s4 = inlined_call_operand.hbm [shape: bf16[512,128], index: 4, kind: input, shape index: {}]   ;;  %s1646_s5 = inlined_call_operand.vmem [shape: f32[1,128], index: 5, kind: input, shape index: {}]   ;;  %s1647_s6 = inlined_call_operand.hbm [shape: bf16[128,128], index: 6, kind: input, shape index: {}]   ;;  %s1648_s7 = inlined_call_operand.vmem [shape: f32[1,128], index: 7, kind: input, shape index: {}]   ;;  %s1649_s8 = inlined_call_operand.vmem [shape: f32[1,128], index: 8, kind: input, shape index: {}]   ;;  %s1650_s9 = inlined_call_operand.vmem [shape: f32[1,128], index: 9, kind: input, shape index: {}]   ;;  %s1651_s10 = inlined_call_operand.hbm [shape: bf16[128,128], index: 10, kind: input, shape index: {}]   ;;  %s1652_s11 = inlined_call_operand.vmem [shape: f32[1,128], index: 11, kind: input, shape index: {}]   ;;  %s1653_s12 = inlined_call_operand.hbm [shape: f32[2,128], index: 12, kind: output, shape index: {}]  }
   0x1   :  { %18 = vsyncpa [#allocation8], 0 }
   0x2   :  { %19 = vsyncpa [#allocation4], 0 }
   0x3   :  { %20 = vsyncpa [#allocation11], 0 }
   0x4   :  { %21 = vsyncpa [#allocation5], 0  ;;  %s63_s23 = sshll.u32 %s1647_s6, 4  ;;  %s1389_s24 = smov [#allocation10]   ;;  %s64_s23 = int_to_ptr.hbm [resolvable:$true] %s63_s23 }
   0x5   :  { %s65_s25 = sshll.u32 %s1389_s24, 4  ;;  %s31_s28 = sshll.u32 %s1643_s2, 4  ;;  %s66_s25 = int_to_ptr.vmem [resolvable:$true] %s65_s25  ;;  %s32_s28 = int_to_ptr.vmem [resolvable:$true] %s31_s28 }
   0x6   :  { %s1390_s29 = smov 64   ;;  %s1391_s30 = smov 4  }
   0x7   :  { %71 = dma.hbm_to_vmem [thread:$0]  %s64_s23, 1024, %s66_s25, [#allocation11], %s1390_s29, %s1390_s29, %s1391_s30  }
   0x8   :  { %s1392_s13 = smov [#allocation3]   ;;  %s40_s16 = sshll.u32 %s1644_s3, 4  ;;  %s41_s16 = int_to_ptr.vmem [resolvable:$true] %s40_s16 }
   0x9   :  { %34 = dma.vmem_to_smem %s32_s28, 128, %s1392_s13, [#allocation6]  }
   0xa   :  { %s48_s18 = sshll.u32 %s1645_s4, 4  ;;  %s1393_s19 = smov [#allocation7]   ;;  %s49_s18 = int_to_ptr.hbm [resolvable:$true] %s48_s18 }
   0xb   :  { %43 = dma.vmem_to_smem %s41_s16, 16, %s1393_s19, [#allocation8]  }
   0xc   :  { %s1394_s20 = smov [#allocation9]   ;;  %s82_s23 = sshll.u32 %s1651_s10, 4  ;;  %s83_s23 = int_to_ptr.hbm [resolvable:$true] %s82_s23 }
   0xd   :  { %s50_s2 = sshll.u32 %s1394_s20, 4  ;;  %s1395_s24 = smov [#allocation12]   ;;  %s51_s2 = int_to_ptr.vmem [resolvable:$true] %s50_s2 }
   0xe   :  { %56 = dma.hbm_to_vmem [thread:$0]  %s49_s18, 4096, %s51_s2, [#allocation4], %s1390_s29, %s1390_s29, %s1391_s30  }
   0xf   :  { %s84_s25 = sshll.u32 %s1395_s24, 4  ;;  %s85_s25 = int_to_ptr.vmem [resolvable:$true] %s84_s25 }
  0x10   :  { %90 = dma.hbm_to_vmem [thread:$0]  %s83_s23, 1024, %s85_s25, [#allocation11], %s1390_s29, %s1390_s29, %s1391_s30  }
  0x11   :  { %1379 = dma.done.wait [#allocation6], 128  }
  0x12   :  { %1380 = vsyncadd [#allocation6], 4294967168 }
  0x13   :  { %1381 = dma.done.wait [#allocation8], 16  }
  0x14   :  { %1382 = vsyncadd [#allocation8], 4294967280 }
  0x15   :  { %1383 = dma.done.wait [#allocation4], 4096  }
  0x16   :  { %1384 = vsyncadd [#allocation4], 4294963200 }
  0x17   :  { %1385 = dma.done.wait [#allocation11], 2048  }
  0x18   :  { %1386 = vsyncadd [#allocation11], 4294965248 }
  0x19   :  { %113 = sfence }
  0x1a   :  { %s966_s3 = sld [smem:[#allocation3 + $0x82]]  ;;  %v158_v0 = vld [vmem:[%s1641_s0] sm:$0xf]  ;;  %s1396_s30 = smov 30   ;;  %vm135_vm0 = vcmask 244736   ;;  %vm143_vm1 = vcmask 394240  }
  0x1b   :  { %s970_s4 = sld [smem:[#allocation3 + $0x102]]  ;;  %v191_v1 = vld [vmem:[%s1641_s0] sm:$0xf]  ;;  %s1397_s22 = smov 79   ;;  %vm176_vm2 = vcmask 796040   ;;  %vm212_vm3 = vcmask 1042192  }
  0x1c   :  { %s965_s26 = sld [smem:[#allocation3 + $0x81]]  ;;  %v1500_v6 = vld [vmem:[%s1641_s0] sm:$0x3]  ;;  %s1398_s18 = smov 49   ;;  %vm213_vm4 = vcmask 150530   ;;  %vm209_vm5 = vcmask 801792  }
  0x1d   :  { %s969_s10 = sld [smem:[#allocation3 + $0x101]]  ;;  %v1505_v8 = vld [vmem:[%s1641_s0] sm:$0x3]  ;;  %s1400_s23 = smov 19   ;;  %vm214_vm6 = vmor %vm213_vm4, %vm212_vm3  ;;  %vm247_vm7 = vcmask 550040   ;;  %vm316_vm8 = vcmask 1042344  }
  0x1e   :  { %s982_s29 = sld [smem:[#allocation3 + $0x282]]  ;;  %v295_v10 = vld [vmem:[%s1641_s0] sm:$0xf]  ;;  %s1401_s24 = smov 117   ;;  %vm317_vm9 = vcmask 306178   ;;  %vm280_vm10 = vcmask 951840  }
  0x1f   :  { %s973_s15 = sld [smem:[#allocation3 + $0x181]]  ;;  %v1516_v15 = vld [vmem:[%s1641_s0] sm:$0x3]  ;;  %s1404_s27 = smov 8   ;;  %vm313_vm11 = vcmask 957440   ;;  %vm318_vm12 = vmor %vm317_vm9, %vm316_vm8  ;;  %vm387_vm13 = vcmask 1042104  }
  0x20   :  { %v159_v2 = vstv %s966_s3  ;;  %s974_s17 = sld [smem:[#allocation3 + $0x182]]  ;;  %v229_v17 = vld [vmem:[%s1641_s0] sm:$0xf]  ;;  %vm388_vm14 = vcmask 60418   ;;  %vm384_vm15 = vcmask 711680   ;;  %vm808_vm3 = vcmask 1041408  }
  0x21   :  { %v160_v3 = vmul.f32 %v159_v2, %v158_v0  ;;  %v192_v4 = vstv %s970_s4  ;;  %s981_s20 = sld [smem:[#allocation3 + $0x281]]  ;;  %v1526_v19 = vld [vmem:[%s1641_s0] sm:$0x3]  ;;  %s1403_s4 = smov 87  }
  0x22   :  { %v193_v5 = vmul.f32 %v192_v4, %v191_v1  ;;  %v150_v7 = vstv %s965_s26  ;;  %s977_s25 = sld [smem:[#allocation3 + $0x201]]  ;;  %v1534_v24 = vld [vmem:[%s1641_s0] sm:$0x3] }
  0x23   :  { %162 = vrot.lane.b32.xlu1 %v160_v3, %s1396_s30  ;;  %v183_v9 = vstv %s969_s10  ;;  %v151_v11 = vmul.f32 %v150_v7, %v1500_v6  ;;  %s978_s26 = sld [smem:[#allocation3 + $0x202]]  ;;  %v262_v26 = vld [vmem:[%s1641_s0] sm:$0xf] }
  0x24   :  { %195 = vrot.lane.b32.xlu0 %v193_v5, %s1396_s30  ;;  %v184_v12 = vmul.f32 %v183_v9, %v1505_v8  ;;  %v296_v13 = vstv %s982_s29  ;;  %s990_s28 = sld [smem:[#allocation3 + $0x382]]  ;;  %v366_v28 = vld [vmem:[%s1641_s0] sm:$0xf] }
  0x25   :  { %v297_v14 = vmul.f32 %v296_v13, %v295_v10  ;;  %v221_v16 = vstv %s973_s15  ;;  %s985_s29 = sld [smem:[#allocation3 + $0x301]]  ;;  %v1549_v33 = vld [vmem:[%s1641_s0] sm:$0x3] }
  0x26   :  { %v230_v18 = vstv %s974_s17  ;;  %v222_v21 = vmul.f32 %v221_v16, %v1516_v15  ;;  %s989_s6 = sld [smem:[#allocation3 + $0x381]]  ;;  %v1556_v35 = vld [vmem:[%s1641_s0] sm:$0x3] }
  0x27   :  { %299 = vrot.lane.b32.xlu2 %v297_v14, %s1396_s30  ;;  %v287_v20 = vstv %s981_s20  ;;  %v231_v22 = vmul.f32 %v230_v18, %v229_v17  ;;  %s986_s19 = sld [smem:[#allocation3 + $0x302]]  ;;  %v333_v37 = vld [vmem:[%s1641_s0] sm:$0xf]  ;;  %s1399_s20 = smov 98  }
  0x28   :  { %v288_v23 = vmul.f32 %v287_v20, %v1526_v19  ;;  %v254_v25 = vstv %s977_s25  ;;  %s962_s3 = sld [smem:[#allocation3 + $0x1]]  ;;  %v1569_v42 = vld [vmem:[%s1641_s0] sm:$0x3] }
  0x29   :  { %v263_v27 = vstv %s978_s26  ;;  %v255_v30 = vmul.f32 %v254_v25, %v1534_v24  ;;  %s963_s10 = sld [smem:[#allocation3 + $0x2]]  ;;  %v128_v45 = vld [vmem:[%s1641_s0] sm:$0xf] }
  0x2a   :  { %v367_v29 = vstv %s990_s28  ;;  %v264_v31 = vmul.f32 %v263_v27, %v262_v26  ;;  %s964_s13 = sld [smem:[#allocation3 + $0x80]]  ;;  %s1405_s28 = smov 38  }
  0x2b   :  { %153 = vrot.lane.b32.xlu1 %v151_v11, %s1397_s22  ;;  %v368_v32 = vmul.f32 %v367_v29, %v366_v28  ;;  %v325_v34 = vstv %s985_s29  ;;  %s968_s14 = sld [smem:[#allocation3 + $0x100]] }
  0x2c   :  { %186 = vrot.lane.b32.xlu0 %v184_v12, %s1397_s22  ;;  %v358_v36 = vstv %s989_s6  ;;  %v326_v39 = vmul.f32 %v325_v34, %v1549_v33  ;;  %s972_s29 = sld [smem:[#allocation3 + $0x180]] }
  0x2d   :  { %v334_v38 = vstv %s986_s19  ;;  %v359_v40 = vmul.f32 %v358_v36, %v1556_v35  ;;  %s1577_s15 = sld [smem:[#allocation3 + $0x280]] }
  0x2e   :  { %v335_v41 = vmul.f32 %v334_v38, %v333_v37  ;;  %v120_v43 = vstv %s962_s3  ;;  %s971_s16 = sld [smem:[#allocation7 + $0x2]]  ;;  %s1402_s3 = smov 68  }
  0x2f   :  { %233 = vrot.lane.b32.xlu2 %v231_v22, %s1396_s30  ;;  %v121_v44 = vmul.f32 %v120_v43, %v1569_v42  ;;  %v129_v46 = vstv %s963_s10  ;;  %s1581_s0 = sld [smem:[#allocation3 + $0x200]] }
  0x30   :  { %v130_v47 = vmul.f32 %v129_v46, %v128_v45  ;;  %v147_v51 = vstv %s964_s13  ;;  %s1586_s6 = sld [smem:[#allocation7 + $0x3]] }
  0x31   :  { %v180_v53 = vstv %s968_s14  ;;  %v148_v54 = vmul.f32 %v147_v51, %v1500_v6  ;;  %s1590_s17 = sld [smem:[#allocation7 + $0x5]] }
  0x32   :  { %v181_v56 = vmul.f32 %v180_v53, %v1505_v8  ;;  %v218_v63 = vstv %s972_s29  ;;  %s1595_s19 = sld [smem:[#allocation7 + $0x4]] }
  0x33   :  { %224 = vrot.lane.b32.xlu1 %v222_v21, %s1397_s22  ;;  %v284_v3 = vstv %s1577_s15  ;;  %v219_v7 = vmul.f32 %v218_v63, %v1516_v15  ;;  %s1600_s2 = sld [smem:[#allocation3 + $0x300]] }
  0x34   :  { %290 = vrot.lane.b32.xlu0 %v288_v23, %s1397_s22  ;;  %v202_v4 = vstv %s971_s16  ;;  %v285_v10 = vmul.f32 %v284_v3, %v1526_v19  ;;  %s991_s21 = sld [smem:[#allocation7 + $0x7]] }
  0x35   :  { %v251_v20 = vstv %s1581_s0  ;;  %s987_s25 = sld [smem:[#allocation7 + $0x6]] }
  0x36   :  { %v240_v22 = vstv %s1586_s6  ;;  %v252_v28 = vmul.f32 %v251_v20, %v1534_v24  ;;  %s115_s13 = sld [smem:[#allocation3]]  ;;  %v1214_v20 = vld [vmem:[#allocation9 + $0xf0] sm:$0xff] }
  0x37   :  { %266 = vrot.lane.b32.xlu2 %v264_v31, %s1396_s30  ;;  %v306_v26 = vstv %s1590_s17  ;;  %s139_s14 = sld [smem:[#allocation7]] }
  0x38   :  { %v273_v24 = vstv %s1595_s19 }
  0x3b   :  { %257 = vrot.lane.b32.xlu1 %v255_v30, %s1397_s22 }
  0x3c   :  { %370 = vrot.lane.b32.xlu0 %v368_v32, %s1396_s30  ;;  %v117_v63 = vstv %s115_s13 }
  0x3f   :  { %361 = vrot.lane.b32.xlu2 %v359_v40, %s1397_s22 }
  0x43   :  { %328 = vrot.lane.b32.xlu1 %v326_v39, %s1397_s22 }
  0x44   :  { %337 = vrot.lane.b32.xlu0 %v335_v41, %s1396_s30 }
  0x47   :  { %132 = vrot.lane.b32.xlu2 %v130_v47, %s1396_s30  ;;  %s1583_s30 = sld [smem:[#allocation3 + $0x380]]  ;;  %v377_v47 = vstv %s991_s21 }
  0x4c   :  { %123 = vrot.lane.b32.xlu0 %v121_v44, %s1397_s22  ;;  %s967_s22 = sld [smem:[#allocation7 + $0x1]] }
  0x4d   :  { %v355_v19 = vstv %s1583_s30 }
  0x4e   :  { %v356_v29 = vmul.f32 %v355_v19, %v1556_v35  ;;  %v322_v35 = vstv %s1600_s2  ;;  %v1205_v19 = vld [vmem:[#allocation9 + $0xa8] sm:$0xff] }
  0x52   :  { %v169_v0 = vstv %s967_s22 }
  0x81   :  { %v300_v48 = vpop.permute.xlu2 %299 }
  0x82   :  { %v301_v12 = vrot.slane %v300_v48, 2 }
  0x84   :  { %v302_v23 = vsel %vm135_vm0, %v300_v48, %v301_v12  ;;  %v1191_v12 = vld [vmem:[#allocation9 + $0x38] sm:$0xff] }
  0x85   :  { %673 = vmatpush.bf16.msra.mxu0 %v1191_v12 }
  0x89   :  { %v234_v52 = vpop.permute.xlu2 %233 }
  0x8a   :  { %v235_v9 = vrot.slane %v234_v52, 2 }
  0x8c   :  { %v236_v15 = vsel %vm135_vm0, %v234_v52, %v235_v9 }
  0x91   :  { %v267_v6 = vpop.permute.xlu2 %266 }
  0x92   :  { %v268_v31 = vrot.slane %v267_v6, 2 }
  0x94   :  { %v269_v43 = vsel %vm135_vm0, %v267_v6, %v268_v31  ;;  %v140_v6 = vstv %s139_s14  ;;  %v1211_v31 = vld [vmem:[#allocation9 + $0xd8] sm:$0xff] }
  0x95   :  { %v163_v49 = vpop.permute.xlu1 %162 }
  0x96   :  { %v196_v50 = vpop.permute.xlu0 %195  ;;  %v164_v55 = vrot.slane %v163_v49, 2 }
  0x97   :  { %v197_v57 = vrot.slane %v196_v50, 2 }
  0x98   :  { %v165_v61 = vsel %vm135_vm0, %v163_v49, %v164_v55 }
  0x99   :  { %v198_v1 = vsel %vm135_vm0, %v196_v50, %v197_v57  ;;  %v362_v32 = vpop.permute.xlu2 %361  ;;  %v323_v50 = vmul.f32 %v322_v35, %v1549_v33  ;;  %v1184_v35 = vld [vmem:[#allocation9] sm:$0xff] }
  0x9a   :  { %v364_v41 = vadd.f32 %v362_v32, %v356_v29  ;;  %v1195_v29 = vld [vmem:[#allocation9 + $0x58] sm:$0xff] }
  0x9d   :  { %v154_v58 = vpop.permute.xlu1 %153 }
  0x9e   :  { %v156_v59 = vadd.f32 %v154_v58, %v148_v54  ;;  %v187_v60 = vpop.permute.xlu0 %186 }
  0x9f   :  { %v189_v62 = vadd.f32 %v187_v60, %v181_v56 }
  0xa0   :  { %v167_v2 = vadd.f32 %v165_v61, %v156_v59  ;;  %v344_v59 = vstv %s987_s25  ;;  %v391_v61 = vld [vmem:[%s1642_s1] sm:$0x3] }
  0xa1   :  { %v200_v5 = vadd.f32 %v198_v1, %v189_v62 }
  0xa2   :  { %v170_v8 = vadd.f32 %v169_v0, %v167_v2  ;;  %v118_v0 = vmul.f32 %v117_v63, %v1569_v42  ;;  %v133_v2 = vpop.permute.xlu2 %132  ;;  %v1207_v42 = vld [vmem:[#allocation9 + $0xb8] sm:$0xff] }
  0xa3   :  { %v203_v11 = vadd.f32 %v202_v4, %v200_v5  ;;  %v134_v4 = vrot.slane %v133_v2, 2  ;;  %699 = vmatpush.bf16.msra.mxu2 %v1207_v42 }
  0xa4   :  { %v171_v13 = vmax.f32 %v170_v8, 0.0 }
  0xa5   :  { %v225_v14 = vpop.permute.xlu1 %224  ;;  %v204_v16 = vmax.f32 %v203_v11, 0.0  ;;  %v136_v5 = vsel %vm135_vm0, %v133_v2, %v134_v4 }
  0xa6   :  { %v227_v17 = vadd.f32 %v225_v14, %v219_v7  ;;  %v291_v18 = vpop.permute.xlu0 %290  ;;  %173 = vrot.lane.b32.xlu2 %v171_v13, %s1398_s18  ;;  %v1199_v13 = vld [vmem:[#allocation9 + $0x78] sm:$0xff] }
  0xa7   :  { %v293_v21 = vadd.f32 %v291_v18, %v285_v10  ;;  %206 = vrot.lane.b32.xlu1 %v204_v16, %s1399_s20  ;;  %v1406_v10 = vmov 0.0   ;;  %v1215_v14 = vld [vmem:[#allocation9 + $0xf8] sm:$0xff]  ;;  %686 = vmatpush.bf16.msra.mxu1 %v1199_v13  ;;  %v1190_v16 = vld [vmem:[#allocation9 + $0x30] sm:$0xff]  ;;  %s949_s20 = sshll.u32 %s1653_s12, 4  ;;  %s950_s20 = int_to_ptr.hbm [resolvable:$true] %s949_s20 }
  0xa8   :  { %v238_v25 = vadd.f32 %v236_v15, %v227_v17  ;;  %114 = vst [vmem:[#allocation2] sm:$0xff] %v1406_v10  ;;  %712 = vmatpush.bf16.msra.mxu3 %v1215_v14  ;;  %v1198_v17 = vld [vmem:[#allocation9 + $0x70] sm:$0xff]  ;;  %674 = vmatpush.bf16.msra.mxu0 %v1190_v16  ;;  %v1189_v15 = vld [vmem:[#allocation9 + $0x28] sm:$0xff] }
  0xa9   :  { %v304_v27 = vadd.f32 %v302_v23, %v293_v21  ;;  %v1206_v18 = vld [vmem:[#allocation9 + $0xb0] sm:$0xff]  ;;  %v1197_v21 = vld [vmem:[#allocation9 + $0x68] sm:$0xff]  ;;  %v1188_v23 = vld [vmem:[#allocation9 + $0x20] sm:$0xff] }
  0xaa   :  { %v241_v30 = vadd.f32 %v240_v22, %v238_v25  ;;  %700 = vmatpush.bf16.msra.mxu2 %v1206_v18  ;;  %v1213_v22 = vld [vmem:[#allocation9 + $0xe8] sm:$0xff]  ;;  %v1196_v25 = vld [vmem:[#allocation9 + $0x60] sm:$0xff]  ;;  %v1252_v10 = vld [vmem:[%s1646_s5] ss:$0 sm:$0xff] }
  0xab   :  { %v307_v34 = vadd.f32 %v306_v26, %v304_v27  ;;  %687 = vmatpush.bf16.msra.mxu1 %v1198_v17  ;;  %v1204_v26 = vld [vmem:[#allocation9 + $0xa0] sm:$0xff] }
  0xac   :  { %v242_v36 = vmax.f32 %v241_v30, 0.0  ;;  %713 = vmatpush.bf16.msra.mxu3 %v1214_v20  ;;  %675 = vmatpush.bf16.msra.mxu0 %v1189_v15  ;;  %v1212_v27 = vld [vmem:[#allocation9 + $0xe0] sm:$0xff]  ;;  %v1203_v30 = vld [vmem:[#allocation9 + $0x98] sm:$0xff] }
  0xad   :  { %v258_v37 = vpop.permute.xlu1 %257  ;;  %v308_v38 = vmax.f32 %v307_v34, 0.0 }
  0xae   :  { %v260_v39 = vadd.f32 %v258_v37, %v252_v28  ;;  %v371_v40 = vpop.permute.xlu0 %370  ;;  %701 = vmatpush.bf16.msra.mxu2 %v1205_v19  ;;  %v1187_v28 = vld [vmem:[#allocation9 + $0x18] sm:$0xff]  ;;  %v1194_v37 = vld [vmem:[#allocation9 + $0x50] sm:$0xff] }
  0xaf   :  { %v372_v44 = vrot.slane %v371_v40, 2  ;;  %244 = vrot.lane.b32.xlu1 %v242_v36, %s1400_s23  ;;  %310 = vrot.lane.b32.xlu0 %v308_v38, %s1401_s24  ;;  %v1186_v36 = vld [vmem:[#allocation9 + $0x10] sm:$0xff] }
  0xb0   :  { %v271_v45 = vadd.f32 %v269_v43, %v260_v39  ;;  %688 = vmatpush.bf16.msra.mxu1 %v1197_v21  ;;  %714 = vmatpush.bf16.msra.mxu3 %v1213_v22  ;;  %v1202_v38 = vld [vmem:[#allocation9 + $0x90] sm:$0xff]  ;;  %v1193_v43 = vld [vmem:[#allocation9 + $0x48] sm:$0xff] }
  0xb1   :  { %v373_v46 = vsel %vm135_vm0, %v371_v40, %v372_v44  ;;  %676 = vmatpush.bf16.msra.mxu0 %v1188_v23  ;;  %v1210_v39 = vld [vmem:[#allocation9 + $0xd0] sm:$0xff]  ;;  %v1201_v44 = vld [vmem:[#allocation9 + $0x88] sm:$0xff] }
  0xb2   :  { %v375_v48 = vadd.f32 %v373_v46, %v364_v41  ;;  %v274_v49 = vadd.f32 %v273_v24, %v271_v45  ;;  %702 = vmatpush.bf16.msra.mxu2 %v1204_v26  ;;  %v1185_v41 = vld [vmem:[#allocation9 + $0x8] sm:$0xff]  ;;  %v1192_v45 = vld [vmem:[#allocation9 + $0x40] sm:$0xff] }
  0xb3   :  { %v1209_v24 = vld [vmem:[#allocation9 + $0xc8] sm:$0xff] }
  0xb4   :  { %v275_v51 = vmax.f32 %v274_v49, 0.0  ;;  %v378_v52 = vadd.f32 %v377_v47, %v375_v48  ;;  %689 = vmatpush.bf16.msra.mxu1 %v1196_v25  ;;  %715 = vmatpush.bf16.msra.mxu3 %v1212_v27  ;;  %v1200_v48 = vld [vmem:[#allocation9 + $0x80] sm:$0xff]  ;;  %v1407_v25 = vmov 2.0   ;;  %v1253_v27 = vld [vmem:[%s1648_s7] ss:$0 sm:$0xff] }
  0xb5   :  { %v329_v53 = vpop.permute.xlu1 %328  ;;  %677 = vmatpush.bf16.msra.mxu0 %v1187_v28  ;;  %v1208_v49 = vld [vmem:[#allocation9 + $0xc0] sm:$0xff]  ;;  %1255 = vrcp.f32 %v1407_v25 }
  0xb6   :  { %v338_v54 = vpop.permute.xlu0 %337  ;;  %277 = vrot.lane.b32.xlu2 %v275_v51, %s1402_s3  ;;  %v331_v55 = vadd.f32 %v329_v53, %v323_v50  ;;  %v379_v56 = vmax.f32 %v378_v52, 0.0  ;;  %703 = vmatpush.bf16.msra.mxu2 %v1203_v30  ;;  %v1223_v53 = vld [vmem:[#allocation10 + $0x38] sm:$0xff] }
  0xb7   :  { %v339_v57 = vrot.slane %v338_v54, 2 }
  0xb8   :  { %381 = vrot.lane.b32.xlu0 %v379_v56, %s1403_s4  ;;  %690 = vmatpush.bf16.msra.mxu1 %v1195_v29  ;;  %v1221_v56 = vld [vmem:[#allocation10 + $0x28] sm:$0xff] }
  0xb9   :  { %v340_v58 = vsel %vm135_vm0, %v338_v54, %v339_v57  ;;  %716 = vmatpush.bf16.msra.mxu3 %v1211_v31  ;;  %678 = vmatpush.bf16.msra.mxu0 %v1186_v36  ;;  %v1222_v54 = vld [vmem:[#allocation10 + $0x30] sm:$0xff]  ;;  %vm351_vm0 = vcmask 705840  }
  0xba   :  { %v342_v60 = vadd.f32 %v340_v58, %v331_v55  ;;  %704 = vmatpush.bf16.msra.mxu2 %v1202_v38  ;;  %v1231_v38 = vld [vmem:[#allocation12 + $0x38] sm:$0xff] }
  0xbb   :  { %v1256_v26 = vpop.eup %1255 }
  0xbc   :  { %v345_v33 = vadd.f32 %v344_v59, %v342_v60  ;;  %691 = vmatpush.bf16.msra.mxu1 %v1194_v37  ;;  %v1220_v60 = vld [vmem:[#allocation10 + $0x20] sm:$0xff]  ;;  %v817_v28 = vmul.f32 2.0, %v1256_v26  ;;  %vm821_vm4 = vweird.f32 %v1256_v26 }
  0xbd   :  { %717 = vmatpush.bf16.msra.mxu3 %v1210_v39  ;;  %679 = vmatpush.bf16.msra.mxu0 %v1185_v41 }
  0xbe   :  { %v346_v62 = vmax.f32 %v345_v33, 0.0  ;;  %393 = vrot.lane.b32.xlu2 %v391_v61, %s1404_s27  ;;  %v124_v1 = vpop.permute.xlu0 %123  ;;  %705 = vmatpush.bf16.msra.mxu2 %v1201_v44  ;;  %v818_v31 = vsub.f32 1.0, %v817_v28  ;;  %v1230_v44 = vld [vmem:[#allocation12 + $0x30] sm:$0xff] }
  0xbf   :  { %v126_v3 = vadd.f32 %v124_v1, %v118_v0 }
  0xc0   :  { %348 = vrot.lane.b32.xlu1 %v346_v62, %s1405_s28  ;;  %692 = vmatpush.bf16.msra.mxu1 %v1193_v43  ;;  %v819_v36 = vmul.f32 %v1256_v26, %v818_v31 }
  0xc1   :  { %v138_v7 = vadd.f32 %v136_v5, %v126_v3  ;;  %718 = vmatpush.bf16.msra.mxu3 %v1209_v24  ;;  %680 = vmatpush.bf16.msra.mxu0 %v1184_v35 }
  0xc2   :  { %706 = vmatpush.bf16.msra.mxu2 %v1200_v48  ;;  %v820_v41 = vadd.f32 %v1256_v26, %v819_v36 }
  0xc3   :  { %v141_v8 = vadd.f32 %v140_v6, %v138_v7  ;;  %v1219_v6 = vld [vmem:[#allocation10 + $0x18] sm:$0xff]  ;;  %v1218_v7 = vld [vmem:[#allocation10 + $0x10] sm:$0xff] }
  0xc4   :  { %693 = vmatpush.bf16.msra.mxu1 %v1192_v45  ;;  %v822_v35 = vsel %vm821_vm4, %v1256_v26, %v820_v41 }
  0xc5   :  { %v142_v9 = vmax.f32 %v141_v8, 0.0  ;;  %719 = vmatpush.bf16.msra.mxu3 %v1208_v49  ;;  %795 = vmatpush.bf16.msrb.mxu0 %v1223_v53  ;;  %v1217_v8 = vld [vmem:[#allocation10 + $0x8] sm:$0xff]  ;;  %v1228_v49 = vld [vmem:[#allocation12 + $0x20] sm:$0xff] }
  0xc7   :  { %144 = vst.msk [vmem:[#allocation2] sm:$0x3] %vm143_vm1, %v142_v9  ;;  %vm389_vm1 = vmor %vm388_vm14, %vm387_vm13  ;;  %v1216_v9 = vld [vmem:[#allocation10] sm:$0xff] }
  0xc8   :  { %928 = vmatpush.bf16.msrb.mxu1 %v1231_v38 }
  0xc9   :  { %796 = vmatpush.bf16.msrb.mxu0 %v1222_v54 }
  0xcc   :  { %929 = vmatpush.bf16.msrb.mxu1 %v1230_v44 }
  0xcd   :  { %797 = vmatpush.bf16.msrb.mxu0 %v1221_v56 }
  0xd1   :  { %798 = vmatpush.bf16.msrb.mxu0 %v1220_v60  ;;  %v1224_v60 = vld [vmem:[#allocation12] sm:$0xff] }
  0xd5   :  { %799 = vmatpush.bf16.msrb.mxu0 %v1219_v6 }
  0xd9   :  { %800 = vmatpush.bf16.msrb.mxu0 %v1218_v7 }
  0xdd   :  { %801 = vmatpush.bf16.msrb.mxu0 %v1217_v8  ;;  %v847_v8 = vld [vmem:[%s1650_s9] sm:$0x1] }
  0xe1   :  { %802 = vmatpush.bf16.msrb.mxu0 %v1216_v9 }
 0x100   :  { %v174_v11 = vpop.permute.xlu2 %173 }
 0x101   :  { %177 = vst.msk [vmem:[#allocation2] sm:$0x3] %vm176_vm2, %v174_v11  ;;  %vm396_vm2 = vcmask 91200  }
 0x110   :  { %v278_v50 = vpop.permute.xlu2 %277 }
 0x118   :  { %v394_v59 = vpop.permute.xlu2 %393 }
 0x119   :  { %v207_v32 = vpop.permute.xlu1 %206 }
 0x11a   :  { %v208_v34 = vrot.slane %v207_v32, 6 }
 0x11c   :  { %v210_v40 = vsel %vm209_vm5, %v208_v34, %v207_v32 }
 0x11d   :  { %215 = vst.msk [vmem:[#allocation2] sm:$0xf] %vm214_vm6, %v210_v40 }
 0x121   :  { %v245_v46 = vpop.permute.xlu1 %244  ;;  %v311_v47 = vpop.permute.xlu0 %310 }
 0x122   :  { %248 = vst.msk [vmem:[#allocation2 + $0x2] sm:$0x3] %vm247_vm7, %v245_v46  ;;  %v312_v51 = vrot.slane %v311_v47, 6  ;;  %v1229_v46 = vld [vmem:[#allocation12 + $0x28] sm:$0xff] }
 0x123   :  { %281 = vst.msk [vmem:[#allocation2 + $0x2] sm:$0x3] %vm280_vm10, %v278_v50  ;;  %930 = vmatpush.bf16.msrb.mxu1 %v1229_v46 }
 0x124   :  { %v314_v52 = vsel %vm313_vm11, %v312_v51, %v311_v47 }
 0x125   :  { %319 = vst.msk [vmem:[#allocation2 + $0x2] sm:$0xf] %vm318_vm12, %v314_v52  ;;  %v1227_v52 = vld [vmem:[#allocation12 + $0x18] sm:$0xff] }
 0x127   :  { %931 = vmatpush.bf16.msrb.mxu1 %v1228_v49 }
 0x12a   :  { %v382_v55 = vpop.permute.xlu0 %381 }
 0x12b   :  { %v383_v57 = vrot.slane %v382_v55, 6  ;;  %932 = vmatpush.bf16.msrb.mxu1 %v1227_v52 }
 0x12d   :  { %v385_v61 = vsel %vm384_vm15, %v383_v57, %v382_v55  ;;  %v1226_v55 = vld [vmem:[#allocation12 + $0x10] sm:$0xff] }
 0x12f   :  { %933 = vmatpush.bf16.msrb.mxu1 %v1226_v55 }
 0x132   :  { %v349_v58 = vpop.permute.xlu1 %348 }
 0x133   :  { %352 = vst.msk [vmem:[#allocation2 + $0x4] sm:$0x3] %vm351_vm0, %v349_v58  ;;  %v1225_v58 = vld [vmem:[#allocation12 + $0x8] sm:$0xff] }
 0x134   :  { %390 = vst.msk [vmem:[#allocation2 + $0x4] sm:$0xf] %vm389_vm1, %v385_v61  ;;  %934 = vmatpush.bf16.msrb.mxu1 %v1225_v58 }
 0x135   :  { %397 = vst.msk [vmem:[#allocation2 + $0x6] sm:$0x3] %vm396_vm2, %v394_v59 }
 0x138   :  { %935 = vmatpush.bf16.msrb.mxu1 %v1224_v60 }
 0x13c   :  { %v398_v33 = vld [vmem:[#allocation2] sm:$0xff] }
 0x13d   :  { %400 = vst [vmem:[#allocation1] ss:$4 sm:$0xff] %v398_v33 }
 0x144   :  { %v401_v62 = vld.sshfl [vmem:[#allocation1] sm:$0xff pattern:$0x73625140]  ;;  %v402_v63 = vld.sshfl [vmem:[#allocation1 + $0x8] sm:$0xff pattern:$0x73625140] }
 0x145   :  { %v409_v0 = vpack.c.bf16 %v401_v62, %v401_v62  ;;  %v410_v1 = vpack.c.bf16 %v402_v63, %v402_v63  ;;  %v403_v2 = vld.sshfl [vmem:[#allocation1 + $0x10] sm:$0xff pattern:$0x73625140]  ;;  %v404_v3 = vld.sshfl [vmem:[#allocation1 + $0x18] sm:$0xff pattern:$0x73625140] }
 0x146   :  { %v411_v4 = vpack.c.bf16 %v403_v2, %v403_v2  ;;  %v412_v5 = vpack.c.bf16 %v404_v3, %v404_v3 }
 0x147   :  { %681 = vmatmul.bf16.vlgmr.msra.gmra.mxu0 %v409_v0  ;;  %694 = vmatmul.bf16.vlgmr.msra.gmra.mxu1 %v410_v1 }
 0x148   :  { %707 = vmatmul.bf16.vlgmr.msra.gmra.mxu2 %v411_v4  ;;  %720 = vmatmul.bf16.vlgmr.msra.gmra.mxu3 %v412_v5  ;;  %v845_v5 = vld [vmem:[%s1649_s8] sm:$0x1]  ;;  %s1408_s8 = smov [#allocation13]  }
 0x149   :  { %s947_s17 = sshll.u32 %s1408_s8, 4  ;;  %s948_s17 = int_to_ptr.vmem [resolvable:$true] %s947_s17 }
 0x1c4   :  { %v682_v11 = vpop.f32.mrf.mxu0  ;;  %v695_v12 = vpop.f32.mrf.mxu1 }
 0x1c5   :  { %v683_v13 = vadd.f32 %v1252_v10, %v682_v11 }
 0x1c7   :  { %v696_v42 = vadd.f32 %v695_v12, %v683_v13 }
 0x1cb   :  { %v708_v14 = vpop.f32.mrf.mxu2  ;;  %v721_v16 = vpop.f32.mrf.mxu3 }
 0x1cc   :  { %v709_v17 = vadd.f32 %v708_v14, %v696_v42  ;;  %v684_v18 = vpop.f32.mrf.mxu0  ;;  %v697_v20 = vpop.f32.mrf.mxu1 }
 0x1ce   :  { %v722_v15 = vadd.f32 %v721_v16, %v709_v17  ;;  %v1254_v17 = vld [vmem:[%s1652_s11] ss:$0 sm:$0xff] }
 0x1d0   :  { %v725_v21 = vmax.f32 %v722_v15, 0.0 }
 0x1d2   :  { %v726_v19 = vpack.c.bf16 %v725_v21, %v725_v21 }
 0x1d3   :  { %v710_v22 = vpop.f32.mrf.mxu2  ;;  %v723_v23 = vpop.f32.mrf.mxu3 }
 0x1d4   :  { %803 = vmatmul.bf16.vlgmr.msrb.gmra.mxu0 %v726_v19 }
 0x251   :  { %v804_v29 = vpop.f32.mrf.mxu0 }
 0x252   :  { %v805_v30 = vadd.f32 %v1253_v27, %v804_v29 }
 0x254   :  { %v809_v32 = vsel %vm808_vm3, %v805_v30, 0.0 }
 0x255   :  { %v810_v34 = vrot.slane %v809_v32, 4 }
 0x257   :  { %v811_v37 = vadd.f32 %v810_v34, %v809_v32 }
 0x259   :  { %v812_v39 = vrot.slane %v811_v37, 2  ;;  %v806_v40 = vpop.f32.mrf.mxu0 }
 0x25b   :  { %v813_v43 = vadd.f32 %v812_v39, %v811_v37 }
 0x25d   :  { %v814_v24 = vrot.slane %v813_v43, 1 }
 0x25f   :  { %v815_v45 = vadd.f32 %v814_v24, %v813_v43 }
 0x261   :  { %v823_v47 = vmul.f32 %v822_v35, %v815_v45 }
 0x263   :  { %v824_v48 = vsub.f32 %v805_v30, %v823_v47 }
 0x265   :  { %v825_v50 = vmul.f32 %v824_v48, %v824_v48 }
 0x267   :  { %v826_v51 = vsel %vm808_vm3, %v825_v50, 0.0 }
 0x268   :  { %v827_v53 = vrot.slane %v826_v51, 4 }
 0x26a   :  { %v828_v54 = vadd.f32 %v827_v53, %v826_v51 }
 0x26c   :  { %v829_v56 = vrot.slane %v828_v54, 2 }
 0x26e   :  { %v830_v57 = vadd.f32 %v829_v56, %v828_v54 }
 0x270   :  { %v831_v59 = vrot.slane %v830_v57, 1 }
 0x272   :  { %v832_v61 = vadd.f32 %v831_v59, %v830_v57 }
 0x274   :  { %v833_v33 = vmul.f32 %v832_v61, %v822_v35 }
 0x276   :  { %v834_v62 = vadd.f32 1e-05, %v833_v33 }
 0x278   :  { %1257 = vrsqrt.f32 %v834_v62  ;;  %vm841_vm6 = vweird.f32 %v834_v62 }
 0x27e   :  { %v1258_v63 = vpop.eup %1257 }
 0x27f   :  { %v836_v0 = vmul.f32 %v1258_v63, %v834_v62  ;;  %vm842_vm5 = vweird.f32 %v1258_v63 }
 0x280   :  { %vm843_vm7 = vmor %vm841_vm6, %vm842_vm5 }
 0x281   :  { %v837_v1 = vmul.f32 %v1258_v63, %v836_v0 }
 0x283   :  { %v838_v2 = vmul.f32 0.5, %v837_v1 }
 0x285   :  { %v839_v3 = vsub.f32 1.5, %v838_v2 }
 0x287   :  { %v840_v4 = vmul.f32 %v1258_v63, %v839_v3 }
 0x289   :  { %v844_v6 = vsel %vm843_vm7, %v1258_v63, %v840_v4 }
 0x28a   :  { %v846_v7 = vmul.f32 %v845_v5, %v844_v6 }
 0x28c   :  { %v848_v9 = vmul.f32 %v846_v7, %v823_v47  ;;  %v851_v10 = vperm.slane %v846_v7, 0 }
 0x28e   :  { %v849_v11 = vsub.f32 %v847_v8, %v848_v9  ;;  %v853_v12 = vmul.f32 %v851_v10, %v805_v30 }
 0x290   :  { %v855_v13 = vperm.slane %v849_v11, 0 }
 0x292   :  { %v857_v42 = vadd.f32 %v855_v13, %v853_v12 }
 0x294   :  { %v858_v14 = vmax.f32 %v857_v42, 0.0 }
 0x296   :  { %v859_v16 = vpack.c.bf16 %v858_v14, %v858_v14 }
 0x298   :  { %936 = vmatmul.bf16.vlgmr.msrb.gmra.mxu1 %v859_v16 }
 0x315   :  { %v937_v18 = vpop.f32.mrf.mxu1 }
 0x316   :  { %v938_v20 = vadd.f32 %v1254_v17, %v937_v18 }
 0x318   :  { %941 = vst [vmem:[#allocation13] sm:$0x3] %v938_v20 }
 0x319   :  { %952 = dma.vmem_to_hbm [thread:$0]  %s948_s17, 32, %s950_s20, [#allocation5]  }
 0x31d   :  { %v939_v15 = vpop.f32.mrf.mxu1 }
 0x31e   :  { %1387 = dma.done.wait [#allocation5], 32  }
 0x31f   :  { %1388 = vsyncadd [#allocation5], 4294967264 }
 0x320   :  { %957 = vsyncpa [#allocation4], 1 }
 0x321   :  { %958 = vsyncpa [#allocation11], 1 }
 0x322   :  { %959 = vsyncpa [#allocation5], 1 }
 0x323   :  { %960 = vsyncpa [#allocation6], 1 }
 0x324   :  { %961 = vsyncpa [#allocation8], 1 }

</bundles_post_ra>
